<compile_context>
chip_gen: v5e
topology: v5e:2x2
jax: 0.10.0
libtpu: 0.0.40
codegen_flags: <defaults>
</compile_context>

<pallas_src>
import numpy as np
import jax
import jax.numpy as jnp
from jax import lax
from jax.experimental import pallas as pl
from jax.experimental.pallas import tpu as pltpu


# ----------------------------------------------------------------------------
# Glue: deterministic matrices for adaptive_avg_pool2d and bilinear upsample
# ----------------------------------------------------------------------------
def make_pool_matrix(H, W, rH, rW):
    """P of shape (H*W, rH*rW) such that x_flat @ P == adaptive_avg_pool2d(x)."""
    P = np.zeros((H * W, rH * rW), dtype=np.float32)
    for i in range(rH):
        hs, he = (i * H) // rH, -(-((i + 1) * H) // rH)
        for j in range(rW):
            ws, we = (j * W) // rW, -(-((j + 1) * W) // rW)
            cnt = (he - hs) * (we - ws)
            for h in range(hs, he):
                for w in range(ws, we):
                    P[h * W + w, i * rW + j] = 1.0 / cnt
    return P


def make_interp_matrix_1d(out_size, in_size):
    """U of shape (out_size, in_size): PyTorch bilinear, align_corners=False."""
    U = np.zeros((out_size, in_size), dtype=np.float32)
    if out_size == in_size:
        np.fill_diagonal(U, 1.0)
        return U
    scale = in_size / out_size
    for o in range(out_size):
        src = (o + 0.5) * scale - 0.5
        src = max(src, 0.0)                       # torch clamps negative src to 0
        i0 = int(src)
        i1 = i0 + (1 if i0 < in_size - 1 else 0)
        lam1 = src - i0
        U[o, i0] += 1.0 - lam1
        U[o, i1] += lam1
    return U


# ----------------------------------------------------------------------------
# Pallas kernel: Bt batch elements per grid step
# ----------------------------------------------------------------------------
def attn_kernel(x_ref, pool_ref, w_ref, up_ref, gamma_ref, o_ref):
    """One grid step = Bt folded batch elements.

    x_ref    : (Bt, C, HW)        io dtype (f32 or bf16)
    pool_ref : (HW, N)            io dtype  adaptive-avg-pool matrix
    w_ref    : (Bt*K, Bt*C + 1)   io dtype  block-diag fused [Wq;Wk;Wv] + bias col
    up_ref   : (N, HW)            io dtype  bilinear upsample matrix (transposed)
    gamma_ref: (1,)               f32, SMEM
    o_ref    : (Bt, C, HW)        io dtype
    """
    Bt, C, HW = x_ref.shape
    N = pool_ref.shape[1]
    K = w_ref.shape[0] // Bt
    Cq = (K - C) // 2
    f32 = jnp.float32

    x2 = x_ref[...].reshape(Bt * C, HW)                       # leading-dim merge (free)

    # 1) adaptive average pool: one MXU matmul over all Bt*C channel rows.
    pooled = jnp.dot(x2, pool_ref[...], preferred_element_type=f32)       # (Bt*C, N)

    # 2) fused q/k/v 1x1 convs (+ biases) for all Bt batches in a single matmul:
    #    block-diagonal weight, biases folded against an appended ones row.
    pooled_aug = jnp.concatenate([pooled, jnp.ones((1, N), f32)], axis=0)  # (Bt*C+1, N)
    w = w_ref[...].astype(f32)
    qkv = jnp.dot(w, pooled_aug, preferred_element_type=f32)              # (Bt*K, N)

    # 3) attention core: tiny N x N problems, one per folded batch (static unroll).
    outs = []
    for b in range(Bt):
        q = qkv[b * K:b * K + Cq]                                         # (Cq, N)
        k = qkv[b * K + Cq:b * K + 2 * Cq]                                # (Cq, N)
        v = qkv[b * K + 2 * Cq:(b + 1) * K]                               # (C,  N)
        # s[i, j] = sum_c q[c, i] * k[c, j]
        s = lax.dot_general(q, k, (((0,), (0,)), ((), ())),
                            preferred_element_type=f32)                   # (N, N)
        m = jnp.max(s, axis=-1, keepdims=True)
        p = jnp.exp(s - m)
        attn = p / jnp.sum(p, axis=-1, keepdims=True)
        # out[c, i] = sum_j v[c, j] * attn[i, j]
        outs.append(lax.dot_general(v, attn, (((1,), (1,)), ((), ())),
                                    preferred_element_type=f32))          # (C, N)
    out_small = jnp.concatenate(outs, axis=0) if Bt > 1 else outs[0]      # (Bt*C, N)

    # 4) bilinear upsample: one lane-dense MXU matmul over all rows.
    out_full = jnp.dot(out_small.astype(up_ref.dtype), up_ref[...],
                       preferred_element_type=f32)                        # (Bt*C, HW)

    # 5) gamma * out + x: residual added in f32, single cast at the store.
    y = gamma_ref[0] * out_full + x2.astype(f32)
    o_ref[...] = y.reshape(Bt, C, HW).astype(o_ref.dtype)


# ----------------------------------------------------------------------------
# Wrapper
# ----------------------------------------------------------------------------
def _choose_block_batch(B, C, HW, itemsize):
    """Largest divisor Bt of B such that Bt*C ~fills the MXU rows and the
    double-buffered (input + output) blocks stay well inside VMEM."""
    vmem_budget = 24 << 20              # in + out blocks, double-buffered
    best = 1
    for bt in range(1, B + 1):
        if B % bt != 0:
            continue
        if 4 * bt * C * HW * itemsize > vmem_budget:
            break
        best = bt
        if bt * C >= 256 or bt >= 8:    # enough MXU rows / cap attention unroll
            break
    return best


def simplified_self_attention(x, params, *, io_dtype=jnp.float32, block_batch=None):
    """x: (B, C, H, W). Returns (B, C, H, W) in io_dtype.

    io_dtype controls only the HBM<->VMEM traffic (x, weights, pool/upsample
    matrices, output); all matmul accumulation, the softmax and the residual
    add run in float32 inside the kernel.
    """
    B, C, H, W = x.shape
    rH, rW = max(H // 8, 1), max(W // 8, 1)
    N, HW = rH * rW, H * W
    Cq = params["wq"].shape[0]
    K = 2 * Cq + C

    itemsize = jnp.dtype(io_dtype).itemsize
    Bt = block_batch if block_batch is not None else _choose_block_batch(B, C, HW, itemsize)
    assert B % Bt == 0, (B, Bt)

    # --- glue (tiny XLA ops): constant matrices + fused block-diagonal weight ---
    pool = jnp.asarray(make_pool_matrix(H, W, rH, rW), dtype=io_dtype)            # (HW, N)
    up_t = jnp.asarray(np.kron(make_interp_matrix_1d(H, rH),
                               make_interp_matrix_1d(W, rW)).T, dtype=io_dtype)   # (N, HW)
    wqkv = jnp.concatenate([params["wq"], params["wk"], params["wv"]], axis=0)    # (K, C)
    bias = jnp.concatenate([params["bq"], params["bk"], params["bv"]], axis=0)    # (K, 1)
    wblock = jnp.concatenate(
        [jnp.kron(jnp.eye(Bt, dtype=wqkv.dtype), wqkv), jnp.tile(bias, (Bt, 1))],
        axis=1).astype(io_dtype)                                                  # (Bt*K, Bt*C+1)
    gamma = params["gamma"].astype(jnp.float32).reshape(1)

    x_flat = x.reshape(B, C, HW).astype(io_dtype)

    const = lambda shape: pl.BlockSpec(shape, lambda b: (0, 0))
    flops = 2 * B * N * (C * HW + K * C + Cq * N + C * N + C * HW)
    bytes_accessed = (2 * B * C * HW + 2 * HW * N + wblock.size) * itemsize
    cost = pl.CostEstimate(flops=int(flops), transcendentals=int(B * N * N),
                           bytes_accessed=int(bytes_accessed))

    out_flat = pl.pallas_call(
        attn_kernel,
        out_shape=jax.ShapeDtypeStruct((B, C, HW), io_dtype),
        grid_spec=pltpu.PrefetchScalarGridSpec(
            num_scalar_prefetch=0,
            grid=(B // Bt,),
            in_specs=[
                pl.BlockSpec((Bt, C, HW), lambda b: (b, 0, 0)),     # x
                const((HW, N)),                                     # pool matrix
                const((Bt * K, Bt * C + 1)),                        # fused block-diag W (+bias)
                const((N, HW)),                                     # upsample matrix
                pl.BlockSpec(memory_space=pltpu.MemorySpace.SMEM),  # gamma scalar
            ],
            out_specs=pl.BlockSpec((Bt, C, HW), lambda b: (b, 0, 0)),
        ),
        compiler_params=pltpu.CompilerParams(
            dimension_semantics=("parallel",),          # no cross-batch accumulation
            vmem_limit_bytes=64 * 1024 * 1024,
        ),
        cost_estimate=cost,
    )(x_flat, pool, wblock, up_t, gamma)

    return out_flat.reshape(B, C, H, W)


# ----------------------------------------------------------------------------
# Pure-JAX reference (same pool / interp matrices) for a correctness check
# ----------------------------------------------------------------------------
def reference_forward(x, params):
    B, C, H, W = x.shape
    rH, rW = max(H // 8, 1), max(W // 8, 1)
    pool = jnp.asarray(make_pool_matrix(H, W, rH, rW))
    up_t = jnp.asarray(np.kron(make_interp_matrix_1d(H, rH),
                               make_interp_matrix_1d(W, rW)).T)
    xf = x.reshape(B, C, H * W)
    pooled = jnp.einsum('bcp,pn->bcn', xf, pool)
    q = jnp.einsum('qc,bcn->bqn', params["wq"], pooled) + params["bq"][None]
    k = jnp.einsum('qc,bcn->bqn', params["wk"], pooled) + params["bk"][None]
    v = jnp.einsum('oc,bcn->bon', params["wv"], pooled) + params["bv"][None]
    s = jnp.einsum('bqi,bqj->bij', q, k)
    attn = jax.nn.softmax(s, axis=-1)
    out_small = jnp.einsum('bcj,bij->bci', v, attn)
    out_full = jnp.einsum('bcn,np->bcp', out_small, up_t)
    return (params["gamma"][0] * out_full + xf).reshape(B, C, H, W)


if __name__ == "__main__":
    # Small shapes consistent with the module: reduction_ratio=8 => C >= 8.
    B, C, H, W = 2, 32, 16, 16
    Cq = C // 8

    key = jax.random.PRNGKey(0)
    kx, kq, kk, kv, kbq, kbk, kbv = jax.random.split(key, 7)

    x = jax.random.normal(kx, (B, C, H, W), dtype=jnp.float32)

    params = {
        # Conv2d(C, C//8, 1) / Conv2d(C, C, 1) weights, squeezed to (out, in).
        "wq": jax.random.normal(kq, (Cq, C), dtype=jnp.float32) * (1.0 / np.sqrt(C)),
        "wk": jax.random.normal(kk, (Cq, C), dtype=jnp.float32) * (1.0 / np.sqrt(C)),
        "wv": jax.random.normal(kv, (C, C), dtype=jnp.float32) * (1.0 / np.sqrt(C)),
        "bq": jax.random.normal(kbq, (Cq, 1), dtype=jnp.float32) * 0.1,
        "bk": jax.random.normal(kbk, (Cq, 1), dtype=jnp.float32) * 0.1,
        "bv": jax.random.normal(kbv, (C, 1), dtype=jnp.float32) * 0.1,
        # nn.Parameter(torch.zeros(1)); set nonzero so the attention branch
        # actually contributes to the output under test.
        "gamma": jnp.array([0.5], dtype=jnp.float32),
    }

    ref = reference_forward(x, params)

    # f32 I/O path: tight check against the pure-JAX reference.
    out = jax.block_until_ready(simplified_self_attention(x, params))
    np.testing.assert_allclose(np.asarray(out), np.asarray(ref), rtol=1e-4, atol=1e-4)

    # bf16 I/O path (halves HBM traffic; accumulation / softmax / residual in f32).
    out_bf16 = jax.block_until_ready(
        simplified_self_attention(x, params, io_dtype=jnp.bfloat16))
    np.testing.assert_allclose(np.asarray(out_bf16.astype(jnp.float32)),
                               np.asarray(ref), rtol=5e-2, atol=5e-2)

    print("KERNEL_OK")
</pallas_src>

<mosaic_0001>
module attributes {stable_mosaic.version = 11 : i64} {
  func.func @attn_kernel(%arg0: i32, %arg1: memref<2x32x256xf32, #tpu.memory_space<vmem>>, %arg2: memref<256x4xf32, #tpu.memory_space<vmem>>, %arg3: memref<80x65xf32, #tpu.memory_space<vmem>>, %arg4: memref<4x256xf32, #tpu.memory_space<vmem>>, %arg5: memref<1xf32, #tpu.memory_space<smem>>, %arg6: memref<2x32x256xf32, #tpu.memory_space<vmem>>) attributes {dimension_semantics = [#tpu.dimension_semantics<parallel>], iteration_bounds = array<i64: 1>, scalar_prefetch = 0 : i64, scratch_operands = 0 : i64, tpu.core_type = #tpu.core_type<tc>, window_params = [{transform_indices = @transform_0, window_bounds = array<i64: 2, 32, 256>}, {pipeline_mode = #tpu.pipeline_mode<synchronous>, transform_indices = @transform_1, window_bounds = array<i64: 256, 4>}, {pipeline_mode = #tpu.pipeline_mode<synchronous>, transform_indices = @transform_2, window_bounds = array<i64: 80, 65>}, {pipeline_mode = #tpu.pipeline_mode<synchronous>, transform_indices = @transform_3, window_bounds = array<i64: 4, 256>}, {transform_indices = @transform_4, window_bounds = array<i64: 1>}, {transform_indices = @transform_5, window_bounds = array<i64: 2, 32, 256>}]} {
    %c0 = arith.constant 0 : index
    %c0_0 = arith.constant 0 : index
    %c0_1 = arith.constant 0 : index
    %0 = vector.load %arg1[%c0, %c0_0, %c0_1] : memref<2x32x256xf32, #tpu.memory_space<vmem>>, vector<2x32x256xf32>
    %1 = vector.shape_cast %0 : vector<2x32x256xf32> to vector<64x256xf32>
    %c0_2 = arith.constant 0 : index
    %c0_3 = arith.constant 0 : index
    %2 = vector.load %arg2[%c0_2, %c0_3] : memref<256x4xf32, #tpu.memory_space<vmem>>, vector<256x4xf32>
    %cst = arith.constant dense<0.000000e+00> : vector<64x4xf32>
    %3 = tpu.matmul %1, %2, %cst {dimension_numbers = #tpu.dot_dimension_numbers<[1], [0], [0], [1], [0, 0, 1, 1], [], []>} : vector<64x256xf32>, vector<256x4xf32>, vector<64x4xf32> -> vector<64x4xf32>
    %cst_4 = arith.constant 1.000000e+00 : f32
    %4 = vector.broadcast %cst_4 : f32 to vector<1x4xf32>
    %5 = tpu.concatenate %3, %4 in 0 : vector<64x4xf32>, vector<1x4xf32> -> vector<65x4xf32>
    %c0_5 = arith.constant 0 : index
    %c0_6 = arith.constant 0 : index
    %6 = vector.load %arg3[%c0_5, %c0_6] : memref<80x65xf32, #tpu.memory_space<vmem>>, vector<80x65xf32>
    %cst_7 = arith.constant dense<0.000000e+00> : vector<80x4xf32>
    %7 = tpu.matmul %6, %5, %cst_7 {dimension_numbers = #tpu.dot_dimension_numbers<[1], [0], [0], [1], [0, 0, 1, 1], [], []>} : vector<80x65xf32>, vector<65x4xf32>, vector<80x4xf32> -> vector<80x4xf32>
    %8 = vector.extract_strided_slice %7 {offsets = [0, 0], sizes = [4, 4], strides = [1, 1]} : vector<80x4xf32> to vector<4x4xf32>
    %9 = vector.extract_strided_slice %7 {offsets = [4, 0], sizes = [4, 4], strides = [1, 1]} : vector<80x4xf32> to vector<4x4xf32>
    %10 = vector.extract_strided_slice %7 {offsets = [8, 0], sizes = [32, 4], strides = [1, 1]} : vector<80x4xf32> to vector<32x4xf32>
    %cst_8 = arith.constant dense<0.000000e+00> : vector<4x4xf32>
    %11 = tpu.matmul %8, %9, %cst_8 {dimension_numbers = #tpu.dot_dimension_numbers<[0], [0], [1], [1], [0, 1, 1, 1], [], []>} : vector<4x4xf32>, vector<4x4xf32>, vector<4x4xf32> -> vector<4x4xf32>
    %cst_9 = arith.constant dense<0xFF800000> : vector<4xf32>
    %12 = vector.multi_reduction <maximumf>, %11, %cst_9 [1] : vector<4x4xf32> to vector<4xf32>
    %13 = vector.shape_cast %12 : vector<4xf32> to vector<4x1xf32>
    %14 = vector.broadcast %13 : vector<4x1xf32> to vector<4x4xf32>
    %15 = arith.subf %11, %14 : vector<4x4xf32>
    %16 = math.exp %15 : vector<4x4xf32>
    %cst_10 = arith.constant dense<0.000000e+00> : vector<4xf32>
    %17 = vector.multi_reduction <add>, %16, %cst_10 [1] : vector<4x4xf32> to vector<4xf32>
    %18 = vector.shape_cast %17 : vector<4xf32> to vector<4x1xf32>
    %19 = vector.broadcast %18 : vector<4x1xf32> to vector<4x4xf32>
    %20 = arith.divf %16, %19 : vector<4x4xf32>
    %cst_11 = arith.constant dense<0.000000e+00> : vector<32x4xf32>
    %21 = tpu.matmul %10, %20, %cst_11 {dimension_numbers = #tpu.dot_dimension_numbers<[1], [1], [0], [0], [0, 0, 1, 0], [], []>} : vector<32x4xf32>, vector<4x4xf32>, vector<32x4xf32> -> vector<32x4xf32>
    %22 = vector.extract_strided_slice %7 {offsets = [40, 0], sizes = [4, 4], strides = [1, 1]} : vector<80x4xf32> to vector<4x4xf32>
    %23 = vector.extract_strided_slice %7 {offsets = [44, 0], sizes = [4, 4], strides = [1, 1]} : vector<80x4xf32> to vector<4x4xf32>
    %24 = vector.extract_strided_slice %7 {offsets = [48, 0], sizes = [32, 4], strides = [1, 1]} : vector<80x4xf32> to vector<32x4xf32>
    %cst_12 = arith.constant dense<0.000000e+00> : vector<4x4xf32>
    %25 = tpu.matmul %22, %23, %cst_12 {dimension_numbers = #tpu.dot_dimension_numbers<[0], [0], [1], [1], [0, 1, 1, 1], [], []>} : vector<4x4xf32>, vector<4x4xf32>, vector<4x4xf32> -> vector<4x4xf32>
    %cst_13 = arith.constant dense<0xFF800000> : vector<4xf32>
    %26 = vector.multi_reduction <maximumf>, %25, %cst_13 [1] : vector<4x4xf32> to vector<4xf32>
    %27 = vector.shape_cast %26 : vector<4xf32> to vector<4x1xf32>
    %28 = vector.broadcast %27 : vector<4x1xf32> to vector<4x4xf32>
    %29 = arith.subf %25, %28 : vector<4x4xf32>
    %30 = math.exp %29 : vector<4x4xf32>
    %cst_14 = arith.constant dense<0.000000e+00> : vector<4xf32>
    %31 = vector.multi_reduction <add>, %30, %cst_14 [1] : vector<4x4xf32> to vector<4xf32>
    %32 = vector.shape_cast %31 : vector<4xf32> to vector<4x1xf32>
    %33 = vector.broadcast %32 : vector<4x1xf32> to vector<4x4xf32>
    %34 = arith.divf %30, %33 : vector<4x4xf32>
    %cst_15 = arith.constant dense<0.000000e+00> : vector<32x4xf32>
    %35 = tpu.matmul %24, %34, %cst_15 {dimension_numbers = #tpu.dot_dimension_numbers<[1], [1], [0], [0], [0, 0, 1, 0], [], []>} : vector<32x4xf32>, vector<4x4xf32>, vector<32x4xf32> -> vector<32x4xf32>
    %36 = tpu.concatenate %21, %35 in 0 : vector<32x4xf32>, vector<32x4xf32> -> vector<64x4xf32>
    %c0_16 = arith.constant 0 : index
    %c0_17 = arith.constant 0 : index
    %37 = vector.load %arg4[%c0_16, %c0_17] : memref<4x256xf32, #tpu.memory_space<vmem>>, vector<4x256xf32>
    %cst_18 = arith.constant dense<0.000000e+00> : vector<64x256xf32>
    %38 = tpu.matmul %36, %37, %cst_18 {dimension_numbers = #tpu.dot_dimension_numbers<[1], [0], [0], [1], [0, 0, 1, 1], [], []>} : vector<64x4xf32>, vector<4x256xf32>, vector<64x256xf32> -> vector<64x256xf32>
    %c0_19 = arith.constant 0 : index
    %39 = memref.load %arg5[%c0_19] : memref<1xf32, #tpu.memory_space<smem>>
    %40 = vector.broadcast %39 : f32 to vector<64x256xf32>
    %41 = arith.mulf %40, %38 : vector<64x256xf32>
    %42 = arith.addf %41, %1 : vector<64x256xf32>
    %43 = vector.shape_cast %42 : vector<64x256xf32> to vector<2x32x256xf32>
    %c0_20 = arith.constant 0 : index
    %c0_21 = arith.constant 0 : index
    %c0_22 = arith.constant 0 : index
    %44 = vector.load %arg6[%c0_20, %c0_21, %c0_22] : memref<2x32x256xf32, #tpu.memory_space<vmem>>, vector<2x32x256xf32>
    tpu.vector_store %arg6[%c0_20, %c0_21, %c0_22], %43 {strides = array<i32>} : memref<2x32x256xf32, #tpu.memory_space<vmem>>, vector<2x32x256xf32>,
    return
  }
  func.func @transform_0(%arg0: i32) -> (i32, i32, i32) {
    %c0_i32 = arith.constant 0 : i32
    %c0_i32_0 = arith.constant 0 : i32
    %c0_i32_1 = arith.constant 0 : i32
    return %arg0, %c0_i32, %c0_i32_0 : i32, i32, i32
  }
  func.func @transform_1(%arg0: i32) -> (i32, i32) {
    %c0_i32 = arith.constant 0 : i32
    %c0_i32_0 = arith.constant 0 : i32
    %c0_i32_1 = arith.constant 0 : i32
    return %c0_i32, %c0_i32_0 : i32, i32
  }
  func.func @transform_2(%arg0: i32) -> (i32, i32) {
    %c0_i32 = arith.constant 0 : i32
    %c0_i32_0 = arith.constant 0 : i32
    %c0_i32_1 = arith.constant 0 : i32
    return %c0_i32, %c0_i32_0 : i32, i32
  }
  func.func @transform_3(%arg0: i32) -> (i32, i32) {
    %c0_i32 = arith.constant 0 : i32
    %c0_i32_0 = arith.constant 0 : i32
    %c0_i32_1 = arith.constant 0 : i32
    return %c0_i32, %c0_i32_0 : i32, i32
  }
  func.func @transform_4(%arg0: i32) -> i32 {
    %c0_i32 = arith.constant 0 : i32
    %c0_i32_0 = arith.constant 0 : i32
    return %c0_i32 : i32
  }
  func.func @transform_5(%arg0: i32) -> (i32, i32, i32) {
    %c0_i32 = arith.constant 0 : i32
    %c0_i32_0 = arith.constant 0 : i32
    %c0_i32_1 = arith.constant 0 : i32
    return %arg0, %c0_i32, %c0_i32_0 : i32, i32, i32
  }
}

</mosaic_0001>

<bundles_post_ra>
// kernel: tpu_custom_call.1
= control target key start
LH: loop header
LB: loop body
LE: loop exit
PB: predicated region body
PF: predicated region fallthrough
CT: control target
= control target key end

     0   :  { %s1129_s0 = inlined_call_operand.vmem [shape: f32[2,32,256], index: 0, kind: input, shape index: {}]   ;;  %s1130_s1 = inlined_call_operand.vmem [shape: f32[256,4], index: 1, kind: input, shape index: {}]   ;;  %s1131_s2 = inlined_call_operand.vmem [shape: f32[80,65], index: 2, kind: input, shape index: {}]   ;;  %s1132_s3 = inlined_call_operand.vmem [shape: f32[4,256], index: 3, kind: input, shape index: {}]   ;;  %s1133_s4 = inlined_call_operand.<no memory space> [shape: f32[1], index: 4, kind: input, shape index: {}]   ;;  %s1134_s5 = inlined_call_operand.hbm [shape: f32[2,32,256], index: 5, kind: output, shape index: {}]  }
   0x1   :  { %v53_v0 = vld [vmem:[%s1130_s1 + $0x78] sm:$0xff]  ;;  %v52_v1 = vld [vmem:[%s1130_s1 + $0x70] sm:$0xff]  ;;  %v51_v2 = vld [vmem:[%s1130_s1 + $0x68] sm:$0xff] }
   0x2   :  { %727 = vmatpush.msra.mxu1 %v53_v0  ;;  %70 = vmatpush.msra.mxu0 %v53_v0  ;;  %v50_v3 = vld [vmem:[%s1130_s1 + $0x60] sm:$0xff]  ;;  %v49_v4 = vld [vmem:[%s1130_s1 + $0x58] sm:$0xff] }
   0x4   :  { %728 = vmatpush.msra.mxu1 %v52_v1  ;;  %71 = vmatpush.msra.mxu0 %v52_v1 }
   0x6   :  { %729 = vmatpush.msra.mxu1 %v51_v2  ;;  %72 = vmatpush.msra.mxu0 %v51_v2 }
   0x8   :  { %730 = vmatpush.msra.mxu1 %v50_v3  ;;  %73 = vmatpush.msra.mxu0 %v50_v3 }
   0x9   :  { %11 = vsyncpa [#allocation4], 0  ;;  %v48_v5 = vld [vmem:[%s1130_s1 + $0x50] sm:$0xff]  ;;  %v47_v6 = vld [vmem:[%s1130_s1 + $0x48] sm:$0xff]  ;;  %vm193_vm0 = vcmask 1040384   ;;  %v783_v56 = vmov 1.0  }
   0xa   :  { %731 = vmatpush.msra.mxu1 %v49_v4  ;;  %74 = vmatpush.msra.mxu0 %v49_v4  ;;  %v46_v7 = vld [vmem:[%s1130_s1 + $0x40] sm:$0xff]  ;;  %v45_v8 = vld [vmem:[%s1130_s1 + $0x38] sm:$0xff]  ;;  %v44_v9 = vld [vmem:[%s1130_s1 + $0x30] sm:$0xff]  ;;  %vm162_vm1 = vcmask 531456   ;;  %vm282_vm2 = vcmask 1043456   ;;  %vm278_vm3 = vcmask 31744  }
   0xb   :  { %v43_v10 = vld [vmem:[%s1130_s1 + $0x28] sm:$0xff]  ;;  %v42_v11 = vld [vmem:[%s1130_s1 + $0x20] sm:$0xff]  ;;  %v41_v12 = vld [vmem:[%s1130_s1 + $0x18] sm:$0xff]  ;;  %684 = vmatpush.msk.msra.mxu2 %vm193_vm0, %v783_v56  ;;  %vm305_vm4 = vcmask 27648   ;;  %s672_s11 = sshll.u32 %s1134_s5, 4  ;;  %s785_s12 = smov 256   ;;  %s673_s11 = int_to_ptr.hbm [resolvable:$true] %s672_s11 }
   0xc   :  { %732 = vmatpush.msra.mxu1 %v48_v5  ;;  %75 = vmatpush.msra.mxu0 %v48_v5  ;;  %v40_v13 = vld [vmem:[%s1130_s1 + $0x10] sm:$0xff]  ;;  %v39_v14 = vld [vmem:[%s1130_s1 + $0x8] sm:$0xff]  ;;  %v38_v15 = vld [vmem:[%s1130_s1] sm:$0xff] }
   0xd   :  { %v868_v16 = vld [vmem:[%s1129_s0 + $0x40] sm:$0xff]  ;;  %v69_v17 = vld [vmem:[%s1130_s1 + $0xf8] sm:$0xff]  ;;  %v68_v19 = vld [vmem:[%s1130_s1 + $0xf0] sm:$0xff] }
   0xe   :  { %733 = vmatpush.msra.mxu1 %v47_v6  ;;  %76 = vmatpush.msra.mxu0 %v47_v6  ;;  %v876_v18 = vld [vmem:[%s1129_s0] sm:$0xff]  ;;  %v67_v20 = vld [vmem:[%s1130_s1 + $0xe8] sm:$0xff]  ;;  %v892_v22 = vld [vmem:[%s1129_s0 + $0x50] sm:$0xff] }
   0xf   :  { %v66_v21 = vld [vmem:[%s1130_s1 + $0xe0] sm:$0xff]  ;;  %v897_v23 = vld [vmem:[%s1129_s0 + $0x10] sm:$0xff]  ;;  %v65_v24 = vld [vmem:[%s1130_s1 + $0xd8] sm:$0xff] }
  0x10   :  { %734 = vmatpush.msra.mxu1 %v46_v7  ;;  %77 = vmatpush.msra.mxu0 %v46_v7  ;;  %v64_v25 = vld [vmem:[%s1130_s1 + $0xd0] sm:$0xff]  ;;  %v63_v26 = vld [vmem:[%s1130_s1 + $0xc8] sm:$0xff]  ;;  %v62_v27 = vld [vmem:[%s1130_s1 + $0xc0] sm:$0xff] }
  0x11   :  { %v916_v28 = vld [vmem:[%s1129_s0 + $0x60] sm:$0xff]  ;;  %v61_v30 = vld [vmem:[%s1130_s1 + $0xb8] sm:$0xff]  ;;  %v60_v31 = vld [vmem:[%s1130_s1 + $0xb0] sm:$0xff] }
  0x12   :  { %735 = vmatpush.msra.mxu1 %v45_v8  ;;  %78 = vmatpush.msra.mxu0 %v45_v8  ;;  %v921_v29 = vld [vmem:[%s1129_s0 + $0x20] sm:$0xff]  ;;  %v59_v32 = vld [vmem:[%s1130_s1 + $0xa8] sm:$0xff]  ;;  %v940_v34 = vld [vmem:[%s1129_s0 + $0x70] sm:$0xff] }
  0x13   :  { %v58_v33 = vld [vmem:[%s1130_s1 + $0xa0] sm:$0xff]  ;;  %v945_v35 = vld [vmem:[%s1129_s0 + $0x30] sm:$0xff]  ;;  %v57_v36 = vld [vmem:[%s1130_s1 + $0x98] sm:$0xff] }
  0x14   :  { %736 = vmatpush.msra.mxu1 %v44_v9  ;;  %79 = vmatpush.msra.mxu0 %v44_v9  ;;  %v56_v37 = vld [vmem:[%s1130_s1 + $0x90] sm:$0xff]  ;;  %v55_v38 = vld [vmem:[%s1130_s1 + $0x88] sm:$0xff]  ;;  %v54_v39 = vld [vmem:[%s1130_s1 + $0x80] sm:$0xff] }
  0x15   :  { %v964_v40 = vld [vmem:[%s1129_s0 + $0x8] sm:$0xff]  ;;  %v970_v41 = vld [vmem:[%s1129_s0 + $0x18] sm:$0xff]  ;;  %v152_v9 = vld [vmem:[%s1131_s2] sm:$0xff] }
  0x16   :  { %737 = vmatpush.msra.mxu1 %v43_v10  ;;  %80 = vmatpush.msra.mxu0 %v43_v10  ;;  %v976_v42 = vld [vmem:[%s1129_s0 + $0x28] sm:$0xff]  ;;  %v982_v43 = vld [vmem:[%s1129_s0 + $0x38] sm:$0xff] }
  0x17   :  { %v988_v44 = vld [vmem:[%s1129_s0 + $0x48] sm:$0xff]  ;;  %v994_v45 = vld [vmem:[%s1129_s0 + $0x58] sm:$0xff] }
  0x18   :  { %738 = vmatpush.msra.mxu1 %v42_v11  ;;  %81 = vmatpush.msra.mxu0 %v42_v11  ;;  %v1000_v46 = vld [vmem:[%s1129_s0 + $0x68] sm:$0xff]  ;;  %v1006_v47 = vld [vmem:[%s1129_s0 + $0x78] sm:$0xff]  ;;  %s786_s0 = smov 16  }
  0x1a   :  { %739 = vmatpush.msra.mxu1 %v41_v12  ;;  %82 = vmatpush.msra.mxu0 %v41_v12 }
  0x1c   :  { %740 = vmatpush.msra.mxu1 %v40_v13  ;;  %83 = vmatpush.msra.mxu0 %v40_v13  ;;  %v153_v13 = vld [vmem:[%s1131_s2 + $0x8] sm:$0xff] }
  0x1e   :  { %741 = vmatpush.msra.mxu1 %v39_v14  ;;  %84 = vmatpush.msra.mxu0 %v39_v14  ;;  %v154_v14 = vld [vmem:[%s1131_s2 + $0x10] sm:$0xff] }
  0x20   :  { %742 = vmatpush.msra.mxu1 %v38_v15  ;;  %85 = vmatpush.msra.mxu0 %v38_v15  ;;  %v155_v15 = vld [vmem:[%s1131_s2 + $0x18] sm:$0xff] }
  0x21   :  { %98 = vmatmul.f32.vlgmr.msra.gmra.mxu1 %v868_v16  ;;  %86 = vmatmul.f32.vlgmr.msra.gmra.mxu0 %v876_v18 }
  0x22   :  { %111 = vmatpush.msrb.mxu1 %v69_v17  ;;  %v156_v17 = vld [vmem:[%s1131_s2 + $0x20] sm:$0xff] }
  0x24   :  { %112 = vmatpush.msrb.mxu1 %v68_v19 }
  0x26   :  { %113 = vmatpush.msrb.mxu1 %v67_v20  ;;  %v157_v20 = vld [vmem:[%s1131_s2 + $0x28] sm:$0xff] }
  0x28   :  { %114 = vmatpush.msrb.mxu1 %v66_v21 }
  0x29   :  { %101 = vmatmul.f32.gmra.mxu1 %v892_v22  ;;  %89 = vmatmul.f32.gmra.mxu0 %v897_v23 }
  0x2a   :  { %115 = vmatpush.msrb.mxu1 %v65_v24 }
  0x2c   :  { %116 = vmatpush.msrb.mxu1 %v64_v25 }
  0x2e   :  { %117 = vmatpush.msrb.mxu1 %v63_v26 }
  0x30   :  { %118 = vmatpush.msrb.mxu1 %v62_v27 }
  0x31   :  { %104 = vmatmul.f32.gmra.mxu1 %v916_v28  ;;  %92 = vmatmul.f32.gmra.mxu0 %v921_v29 }
  0x32   :  { %119 = vmatpush.msrb.mxu1 %v61_v30 }
  0x34   :  { %120 = vmatpush.msrb.mxu1 %v60_v31 }
  0x36   :  { %121 = vmatpush.msrb.mxu1 %v59_v32 }
  0x38   :  { %122 = vmatpush.msrb.mxu1 %v58_v33  ;;  %v158_v33 = vld [vmem:[%s1131_s2 + $0x30] sm:$0xff] }
  0x39   :  { %107 = vmatmul.f32.gmra.mxu1 %v940_v34  ;;  %95 = vmatmul.f32.gmra.mxu0 %v945_v35 }
  0x3a   :  { %123 = vmatpush.msrb.mxu1 %v57_v36  ;;  %v159_v36 = vld [vmem:[%s1131_s2 + $0x38] sm:$0xff] }
  0x3c   :  { %124 = vmatpush.msrb.mxu1 %v56_v37 }
  0x3e   :  { %125 = vmatpush.msrb.mxu1 %v55_v38 }
  0x40   :  { %126 = vmatpush.msrb.mxu1 %v54_v39 }
  0x41   :  { %127 = vmatmul.f32.vlgmr.msrb.gmra.mxu1 %v964_v40 }
  0x49   :  { %130 = vmatmul.f32.gmra.mxu1 %v970_v41 }
  0x51   :  { %133 = vmatmul.f32.gmra.mxu1 %v976_v42 }
  0x59   :  { %136 = vmatmul.f32.gmra.mxu1 %v982_v43 }
  0x61   :  { %139 = vmatmul.f32.gmra.mxu1 %v988_v44 }
  0x69   :  { %142 = vmatmul.f32.gmra.mxu1 %v994_v45 }
  0x71   :  { %145 = vmatmul.f32.gmra.mxu1 %v1000_v46 }
  0x79   :  { %148 = vmatmul.f32.gmra.mxu1 %v1006_v47 }
  0x9e   :  { %v99_v48 = vpop.f32.mrf.mxu1  ;;  %v87_v57 = vpop.f32.mrf.mxu0 }
  0xa6   :  { %v102_v49 = vpop.f32.mrf.mxu1  ;;  %v90_v60 = vpop.f32.mrf.mxu0 }
  0xae   :  { %v105_v50 = vpop.f32.mrf.mxu1  ;;  %v93_v62 = vpop.f32.mrf.mxu0 }
  0xb6   :  { %v108_v51 = vpop.f32.mrf.mxu1  ;;  %v96_v3 = vpop.f32.mrf.mxu0 }
  0xbe   :  { %v128_v52 = vpop.f32.mrf.mxu1 }
  0xbf   :  { %v129_v8 = vadd.f32 %v128_v52, %v87_v57 }
  0xc6   :  { %v131_v53 = vpop.f32.mrf.mxu1 }
  0xc7   :  { %v132_v7 = vadd.f32 %v131_v53, %v90_v60 }
  0xce   :  { %v134_v54 = vpop.f32.mrf.mxu1 }
  0xcf   :  { %v135_v6 = vadd.f32 %v134_v54, %v93_v62 }
  0xd6   :  { %v137_v55 = vpop.f32.mrf.mxu1 }
  0xd7   :  { %v138_v5 = vadd.f32 %v137_v55, %v96_v3 }
  0xde   :  { %v140_v58 = vpop.f32.mrf.mxu1 }
  0xdf   :  { %v141_v4 = vadd.f32 %v140_v58, %v99_v48  ;;  %v160_v48 = vld [vmem:[%s1131_s2 + $0x40] sm:$0xff] }
  0xe6   :  { %v143_v59 = vpop.f32.mrf.mxu1 }
  0xe7   :  { %v144_v2 = vadd.f32 %v143_v59, %v102_v49  ;;  %v161_v49 = vld [vmem:[%s1131_s2 + $0x48] sm:$0xff] }
  0xee   :  { %v146_v61 = vpop.f32.mrf.mxu1 }
  0xef   :  { %v147_v1 = vadd.f32 %v146_v61, %v105_v50 }
  0xf6   :  { %v149_v63 = vpop.f32.mrf.mxu1 }
  0xf7   :  { %v150_v0 = vadd.f32 %v149_v63, %v108_v51 }
  0xf9   :  { %205 = vmatpush.msra.mxu2 %v150_v0  ;;  %v501_v0 = vld [vmem:[%s1132_s3] sm:$0xff] }
  0xfa   :  { %503 = vst [vmem:[#allocation1] ss:$2 sm:$0xff] %v501_v0 }
  0xfb   :  { %206 = vmatpush.msra.mxu2 %v147_v1 }
  0xfd   :  { %207 = vmatpush.msra.mxu2 %v144_v2 }
  0xff   :  { %208 = vmatpush.msra.mxu2 %v141_v4 }
 0x101   :  { %209 = vmatpush.msra.mxu2 %v138_v5  ;;  %v505_v2 = vld.sshfl [vmem:[#allocation1 + $0x8] sm:$0xff pattern:$0x75316420] }
 0x102   :  { %718 = vmatpush.msk.msrb.mxu0 %vm282_vm2, %v505_v2 }
 0x103   :  { %210 = vmatpush.msra.mxu2 %v135_v6 }
 0x105   :  { %211 = vmatpush.msra.mxu2 %v132_v7 }
 0x107   :  { %212 = vmatpush.msra.mxu2 %v129_v8 }
 0x108   :  { %685 = vmatmul.msk.f32.vlgmr.msra.gmra.mxu2 %vm162_vm1, %v152_v9 }
 0x110   :  { %686 = vmatmul.msk.f32.gmra.mxu2 %vm162_vm1, %v153_v13 }
 0x118   :  { %687 = vmatmul.msk.f32.gmra.mxu2 %vm162_vm1, %v154_v14 }
 0x120   :  { %688 = vmatmul.msk.f32.gmra.mxu2 %vm162_vm1, %v155_v15 }
 0x128   :  { %689 = vmatmul.msk.f32.gmra.mxu2 %vm162_vm1, %v156_v17 }
 0x130   :  { %690 = vmatmul.msk.f32.gmra.mxu2 %vm162_vm1, %v157_v20 }
 0x138   :  { %691 = vmatmul.msk.f32.gmra.mxu2 %vm162_vm1, %v158_v33 }
 0x140   :  { %692 = vmatmul.msk.f32.gmra.mxu2 %vm162_vm1, %v159_v36 }
 0x148   :  { %693 = vmatmul.msk.f32.gmra.mxu2 %vm162_vm1, %v160_v48 }
 0x150   :  { %694 = vmatmul.msk.f32.gmra.mxu2 %vm162_vm1, %v161_v49 }
 0x18b   :  { %v214_v10 = vpop.f32.mrf.mxu2 }
 0x18c   :  { %244 = vxpose.xlu0.b32.start.end [1/1] (short) (narrow) %v214_v10, 8  ;;  %v277_v11 = vrot.slane %v214_v10, 4 }
 0x18e   :  { %695 = vmatpush.msk.msra.mxu3 %vm282_vm2, %v277_v11 }
 0x193   :  { %v217_v31 = vpop.f32.mrf.mxu2 }
 0x19b   :  { %v220_v32 = vpop.f32.mrf.mxu2 }
 0x1a3   :  { %v223_v37 = vpop.f32.mrf.mxu2 }
 0x1ab   :  { %v226_v38 = vpop.f32.mrf.mxu2 }
 0x1b3   :  { %v229_v39 = vpop.f32.mrf.mxu2 }
 0x1b4   :  { %v407_v62 = vrot.slane %v229_v39, 4 }
 0x1bb   :  { %v232_v1 = vpop.f32.mrf.mxu2 }
 0x1c3   :  { %v235_v3 = vpop.f32.mrf.mxu2 }
 0x1cb   :  { %v238_v4 = vpop.f32.mrf.mxu2 }
 0x1d3   :  { %v241_v5 = vpop.f32.mrf.mxu2 }
 0x230   :  { %v260_v12 = vpop.trf.xlu0 }
 0x231   :  { %696 = vmatmul.msk.f32.vlgmr.msra.gmra.mxu3 %vm278_vm3, %v260_v12  ;;  %v1073_v12 = vstv %s1133_s4  ;;  %s784_s4 = smov [#allocation3]  }
 0x232   :  { %s670_s8 = sshll.u32 %s784_s4, 4  ;;  %s671_s8 = int_to_ptr.vmem [resolvable:$true] %s670_s8 }
 0x2b4   :  { %v302_v19 = vpop.f32.mrf.mxu3 }
 0x2b5   :  { %v306_v21 = vsel %vm305_vm4, %v302_v19, -inf }
 0x2b6   :  { %307 = vmax.xlane.f32.xlu0 %v306_v21 }
 0x329   :  { %v308_v24 = vpop.xlane.xlu0 %307 }
 0x32a   :  { %v309_v25 = vsub.f32 %v302_v19, %v308_v24 }
 0x32c   :  { %v310_v26 = vmul.f32 1.442695, %v309_v25 }
 0x32e   :  { %749 = vpow2.f32 %v310_v26 }
 0x334   :  { %v750_v27 = vpop.eup %749 }
 0x335   :  { %v312_v30 = vsel %vm305_vm4, %v750_v27, 0.0 }
 0x336   :  { %313 = vadd.xlane.f32.xlu1 %v312_v30 }
 0x370   :  { %374 = vxpose.xlu1.b32.start.end [1/1] (short) (narrow) %v229_v39, 8 }
 0x3a9   :  { %v314_v50 = vpop.xlane.xlu1 %313 }
 0x3aa   :  { %751 = vrcp.f32 %v314_v50  ;;  %v326_v54 = vand.u32 2147483648, %v314_v50  ;;  %v324_v56 = vand.u32 2147483647, %v314_v50  ;;  %vm320_vm6 = vweird.f32 %v314_v50 }
 0x3ac   :  { %v327_v58 = vor.u32 1.1754944e-38, %v326_v54  ;;  %vm325_vm8 = vcmp.eq.f32.partialorder %v324_v56, 8.507059e+37  ;;  %v504_v54 = vld.sshfl [vmem:[#allocation1] sm:$0xff pattern:$0x75316420] }
 0x3b0   :  { %v752_v51 = vpop.eup %751 }
 0x3b1   :  { %v316_v52 = vmul.f32 %v752_v51, %v314_v50  ;;  %vm321_vm5 = vweird.f32 %v752_v51 }
 0x3b2   :  { %vm322_vm7 = vmor %vm320_vm6, %vm321_vm5 }
 0x3b3   :  { %v317_v53 = vsub.f32 1.0, %v316_v52 }
 0x3b5   :  { %v318_v55 = vmul.f32 %v752_v51, %v317_v53 }
 0x3b7   :  { %v319_v57 = vadd.f32 %v752_v51, %v318_v55 }
 0x3b9   :  { %v323_v59 = vsel %vm322_vm7, %v752_v51, %v319_v57 }
 0x3ba   :  { %v328_v60 = vsel %vm325_vm8, %v327_v58, %v323_v59 }
 0x3bb   :  { %v329_v61 = vmul.f32 %v750_v27, %v328_v60 }
 0x3bd   :  { %697 = vmatpush.xpose.msk.msrb.mxu2 %vm278_vm3, %v329_v61  ;;  %743 = vmatpush.xpose.msk.msrb.mxu3 %vm278_vm3, %v329_v61 }
 0x3c0   :  { %698 = vmatmul.msk.f32.vlgmr.msrb.gmra.mxu2 %vm278_vm3, %v217_v31  ;;  %701 = vmatmul.msk.f32.vlgmr.msrb.gmra.mxu3 %vm278_vm3, %v226_v38 }
 0x3c1   :  { %702 = vmatpush.msk.msra.mxu3 %vm282_vm2, %v407_v62 }
 0x3c8   :  { %699 = vmatmul.msk.f32.gmra.mxu2 %vm278_vm3, %v220_v32 }
 0x3d0   :  { %700 = vmatmul.msk.f32.gmra.mxu2 %vm278_vm3, %v223_v37 }
 0x414   :  { %v390_v63 = vpop.trf.xlu1 }
 0x415   :  { %703 = vmatmul.msk.f32.vlgmr.msra.gmra.mxu3 %vm278_vm3, %v390_v63 }
 0x443   :  { %v362_v6 = vpop.f32.mrf.mxu2  ;;  %v371_v9 = vpop.f32.mrf.mxu3 }
 0x444   :  { %719 = vmatmul.msk.f32.vlgmr.msrb.gmra.mxu0 %vm278_vm3, %v362_v6 }
 0x44b   :  { %v365_v7 = vpop.f32.mrf.mxu2 }
 0x44c   :  { %720 = vmatmul.msk.f32.gmra.mxu0 %vm278_vm3, %v365_v7 }
 0x453   :  { %v368_v8 = vpop.f32.mrf.mxu2 }
 0x454   :  { %721 = vmatmul.msk.f32.gmra.mxu0 %vm278_vm3, %v368_v8 }
 0x45c   :  { %722 = vmatmul.msk.f32.gmra.mxu0 %vm278_vm3, %v371_v9 }
 0x498   :  { %v430_v10 = vpop.f32.mrf.mxu3 }
 0x499   :  { %v433_v11 = vsel %vm305_vm4, %v430_v10, -inf }
 0x49a   :  { %434 = vmax.xlane.f32.xlu2 %v433_v11 }
 0x4c1   :  { %v592_v13 = vpop.f32.mrf.mxu0 }
 0x4c2   :  { %v619_v14 = vmul.f32 %v1073_v12, %v592_v13 }
 0x4c4   :  { %v635_v15 = vadd.f32 %v619_v14, %v964_v40 }
 0x4c6   :  { %651 = vst [vmem:[#allocation3 + $0x8] sm:$0xff] %v635_v15 }
 0x4c9   :  { %v595_v17 = vpop.f32.mrf.mxu0 }
 0x4ca   :  { %v621_v19 = vmul.f32 %v1073_v12, %v595_v17 }
 0x4cc   :  { %v637_v20 = vadd.f32 %v621_v19, %v970_v41 }
 0x4ce   :  { %653 = vst [vmem:[#allocation3 + $0x18] sm:$0xff] %v637_v20 }
 0x4d1   :  { %v598_v21 = vpop.f32.mrf.mxu0 }
 0x4d2   :  { %v623_v24 = vmul.f32 %v1073_v12, %v598_v21 }
 0x4d4   :  { %v639_v25 = vadd.f32 %v623_v24, %v976_v42 }
 0x4d6   :  { %655 = vst [vmem:[#allocation3 + $0x28] sm:$0xff] %v639_v25 }
 0x4d9   :  { %v601_v26 = vpop.f32.mrf.mxu0 }
 0x4da   :  { %v625_v27 = vmul.f32 %v1073_v12, %v601_v26 }
 0x4dc   :  { %v641_v30 = vadd.f32 %v625_v27, %v982_v43 }
 0x4de   :  { %657 = vst [vmem:[#allocation3 + $0x38] sm:$0xff] %v641_v30 }
 0x50d   :  { %v435_v40 = vpop.xlane.xlu2 %434 }
 0x50e   :  { %v436_v31 = vsub.f32 %v430_v10, %v435_v40 }
 0x510   :  { %v437_v32 = vmul.f32 1.442695, %v436_v31 }
 0x512   :  { %753 = vpow2.f32 %v437_v32 }
 0x518   :  { %v754_v33 = vpop.eup %753 }
 0x519   :  { %v439_v41 = vsel %vm305_vm4, %v754_v33, 0.0 }
 0x51a   :  { %440 = vadd.xlane.f32.xlu2 %v439_v41 }
 0x58d   :  { %v441_v36 = vpop.xlane.xlu2 %440 }
 0x58e   :  { %755 = vrcp.f32 %v441_v36  ;;  %v453_v39 = vand.u32 2147483648, %v441_v36  ;;  %v451_v49 = vand.u32 2147483647, %v441_v36  ;;  %vm447_vm10 = vweird.f32 %v441_v36 }
 0x590   :  { %v454_v43 = vor.u32 1.1754944e-38, %v453_v39  ;;  %vm452_vm12 = vcmp.eq.f32.partialorder %v451_v49, 8.507059e+37 }
 0x594   :  { %v756_v37 = vpop.eup %755 }
 0x595   :  { %v443_v38 = vmul.f32 %v756_v37, %v441_v36  ;;  %vm448_vm9 = vweird.f32 %v756_v37 }
 0x596   :  { %vm449_vm11 = vmor %vm447_vm10, %vm448_vm9 }
 0x597   :  { %v444_v42 = vsub.f32 1.0, %v443_v38 }
 0x599   :  { %v445_v48 = vmul.f32 %v756_v37, %v444_v42 }
 0x59b   :  { %v446_v50 = vadd.f32 %v756_v37, %v445_v48 }
 0x59d   :  { %v450_v51 = vsel %vm449_vm11, %v756_v37, %v446_v50 }
 0x59e   :  { %v455_v52 = vsel %vm452_vm12, %v454_v43, %v450_v51 }
 0x59f   :  { %v456_v53 = vmul.f32 %v754_v33, %v455_v52 }
 0x5a1   :  { %704 = vmatpush.xpose.msk.msrb.mxu3 %vm278_vm3, %v456_v53 }
 0x5a4   :  { %705 = vmatmul.msk.f32.vlgmr.msrb.gmra.mxu3 %vm278_vm3, %v232_v1 }
 0x5a5   :  { %709 = vmatpush.msk.msra.mxu3 %vm282_vm2, %v504_v54 }
 0x5ac   :  { %706 = vmatmul.msk.f32.gmra.mxu3 %vm278_vm3, %v235_v3 }
 0x5b4   :  { %707 = vmatmul.msk.f32.gmra.mxu3 %vm278_vm3, %v238_v4 }
 0x5bc   :  { %708 = vmatmul.msk.f32.gmra.mxu3 %vm278_vm3, %v241_v5 }
 0x5c4   :  { %710 = vmatmul.msk.f32.vlgmr.msra.gmra.mxu3 %vm278_vm3, %v362_v6 }
 0x5cc   :  { %711 = vmatmul.msk.f32.gmra.mxu3 %vm278_vm3, %v365_v7 }
 0x5d4   :  { %712 = vmatmul.msk.f32.gmra.mxu3 %vm278_vm3, %v368_v8 }
 0x5dc   :  { %713 = vmatmul.msk.f32.gmra.mxu3 %vm278_vm3, %v371_v9 }
 0x627   :  { %v489_v55 = vpop.f32.mrf.mxu3 }
 0x628   :  { %714 = vmatmul.msk.f32.gmra.mxu3 %vm278_vm3, %v489_v55  ;;  %723 = vmatmul.msk.f32.gmra.mxu0 %vm278_vm3, %v489_v55 }
 0x62f   :  { %v492_v56 = vpop.f32.mrf.mxu3 }
 0x630   :  { %715 = vmatmul.msk.f32.gmra.mxu3 %vm278_vm3, %v492_v56  ;;  %724 = vmatmul.msk.f32.gmra.mxu0 %vm278_vm3, %v492_v56 }
 0x637   :  { %v495_v57 = vpop.f32.mrf.mxu3 }
 0x638   :  { %716 = vmatmul.msk.f32.gmra.mxu3 %vm278_vm3, %v495_v57  ;;  %725 = vmatmul.msk.f32.gmra.mxu0 %vm278_vm3, %v495_v57 }
 0x63f   :  { %v498_v58 = vpop.f32.mrf.mxu3 }
 0x640   :  { %717 = vmatmul.msk.f32.gmra.mxu3 %vm278_vm3, %v498_v58  ;;  %726 = vmatmul.msk.f32.gmra.mxu0 %vm278_vm3, %v498_v58 }
 0x647   :  { %v551_v59 = vpop.f32.mrf.mxu3 }
 0x648   :  { %v618_v60 = vmul.f32 %v1073_v12, %v551_v59 }
 0x64a   :  { %v634_v61 = vadd.f32 %v618_v60, %v876_v18 }
 0x64c   :  { %650 = vst [vmem:[#allocation3] sm:$0xff] %v634_v61 }
 0x64f   :  { %v554_v62 = vpop.f32.mrf.mxu3 }
 0x650   :  { %v620_v63 = vmul.f32 %v1073_v12, %v554_v62 }
 0x652   :  { %v636_v0 = vadd.f32 %v620_v63, %v897_v23 }
 0x654   :  { %652 = vst [vmem:[#allocation3 + $0x10] sm:$0xff] %v636_v0 }
 0x657   :  { %v557_v1 = vpop.f32.mrf.mxu3 }
 0x658   :  { %v622_v2 = vmul.f32 %v1073_v12, %v557_v1 }
 0x65a   :  { %v638_v3 = vadd.f32 %v622_v2, %v921_v29 }
 0x65c   :  { %654 = vst [vmem:[#allocation3 + $0x20] sm:$0xff] %v638_v3 }
 0x65f   :  { %v560_v4 = vpop.f32.mrf.mxu3 }
 0x660   :  { %v624_v5 = vmul.f32 %v1073_v12, %v560_v4 }
 0x662   :  { %v640_v6 = vadd.f32 %v624_v5, %v945_v35 }
 0x664   :  { %656 = vst [vmem:[#allocation3 + $0x30] sm:$0xff] %v640_v6 }
 0x6a5   :  { %v604_v18 = vpop.f32.mrf.mxu0 }
 0x6a6   :  { %v627_v7 = vmul.f32 %v1073_v12, %v604_v18 }
 0x6a8   :  { %v643_v8 = vadd.f32 %v627_v7, %v988_v44 }
 0x6aa   :  { %659 = vst [vmem:[#allocation3 + $0x48] sm:$0xff] %v643_v8 }
 0x6ab   :  { %v563_v23 = vpop.f32.mrf.mxu3 }
 0x6ac   :  { %v626_v9 = vmul.f32 %v1073_v12, %v563_v23 }
 0x6ad   :  { %v607_v10 = vpop.f32.mrf.mxu0 }
 0x6ae   :  { %v642_v11 = vadd.f32 %v626_v9, %v868_v16  ;;  %v629_v29 = vmul.f32 %v1073_v12, %v607_v10 }
 0x6b0   :  { %658 = vst [vmem:[#allocation3 + $0x40] sm:$0xff] %v642_v11  ;;  %v645_v13 = vadd.f32 %v629_v29, %v994_v45 }
 0x6b2   :  { %661 = vst [vmem:[#allocation3 + $0x58] sm:$0xff] %v645_v13 }
 0x6b3   :  { %v566_v35 = vpop.f32.mrf.mxu3 }
 0x6b4   :  { %v628_v14 = vmul.f32 %v1073_v12, %v566_v35 }
 0x6b5   :  { %v610_v15 = vpop.f32.mrf.mxu0 }
 0x6b6   :  { %v644_v17 = vadd.f32 %v628_v14, %v892_v22  ;;  %v631_v44 = vmul.f32 %v1073_v12, %v610_v15 }
 0x6b8   :  { %660 = vst [vmem:[#allocation3 + $0x50] sm:$0xff] %v644_v17  ;;  %v647_v19 = vadd.f32 %v631_v44, %v1000_v46 }
 0x6ba   :  { %663 = vst [vmem:[#allocation3 + $0x68] sm:$0xff] %v647_v19 }
 0x6bb   :  { %v569_v20 = vpop.f32.mrf.mxu3 }
 0x6bc   :  { %v630_v16 = vmul.f32 %v1073_v12, %v569_v20 }
 0x6bd   :  { %v613_v21 = vpop.f32.mrf.mxu0 }
 0x6be   :  { %v646_v24 = vadd.f32 %v630_v16, %v916_v28  ;;  %v633_v45 = vmul.f32 %v1073_v12, %v613_v21 }
 0x6c0   :  { %662 = vst [vmem:[#allocation3 + $0x60] sm:$0xff] %v646_v24  ;;  %v649_v25 = vadd.f32 %v633_v45, %v1006_v47 }
 0x6c2   :  { %665 = vst [vmem:[#allocation3 + $0x78] sm:$0xff] %v649_v25 }
 0x6c3   :  { %v572_v22 = vpop.f32.mrf.mxu3 }
 0x6c4   :  { %v632_v46 = vmul.f32 %v1073_v12, %v572_v22 }
 0x6c6   :  { %v648_v26 = vadd.f32 %v632_v46, %v940_v34 }
 0x6c8   :  { %664 = vst [vmem:[#allocation3 + $0x70] sm:$0xff] %v648_v26 }
 0x6c9   :  { %678 = dma.vmem_to_hbm [thread:$0]  %s671_s8, 2048, %s673_s11, [#allocation4], %s785_s12, %s785_s12, %s786_s0  }
 0x6ca   :  { %781 = dma.done.wait [#allocation4], 2048  }
 0x6cb   :  { %782 = vsyncadd [#allocation4], 4294965248 }
 0x6cc   :  { %683 = vsyncpa [#allocation4], 1 }

</bundles_post_ra>
